<compile_context>
chip_gen: v5e
topology: v5e:2x2
jax: 0.10.0
libtpu: 0.0.40
codegen_flags: <defaults>
</compile_context>

<pallas_src>
import functools

import jax
import jax.numpy as jnp
from jax.experimental import pallas as pl
from jax.experimental.pallas import tpu as pltpu


# Budget for the 4 double-buffered input tiles (4 arrays x 2 pipeline buffers).
_TILE_BUDGET_BYTES = 24 << 20
# Scoped-VMEM limit: above the 32 MiB default, below v7x's 64 MiB physical VMEM.
_VMEM_LIMIT_BYTES = 48 << 20


def _choose_block_sizes(B, C, itemsize):
    """Pick (block_b, block_c) so 4 x 2 x block_b x block_c x itemsize fits budget."""
    sublane = 16 if itemsize == 2 else 8

    def rows_for(bc):
        return _TILE_BUDGET_BYTES // (4 * 2 * bc * itemsize)

    # Prefer full-C blocks (single lane reduction, no class-axis accumulation).
    block_c = C
    if rows_for(C) < sublane and C > 128:
        # Class axis too wide for a decent batch tile: tile it.
        # Block must be a multiple of 128 that divides C (else keep full C).
        for cand in (32768, 16384, 8192, 4096, 2048, 1024, 512, 256, 128):
            if C % cand == 0:
                block_c = cand
                break

    block_b = rows_for(block_c)
    if block_b >= B:
        block_b = B                                   # full batch in one block
    else:
        block_b = max(sublane, (block_b // sublane) * sublane)
    return block_b, block_c


def _two_headed_loss_kernel(pred_ref, pred_p_ref, labels_ref, labels_p_ref,
                            out_ref, *, gamma):
    k = pl.program_id(1)  # class-reduction axis (last grid axis, "arbitrary")

    pred = pred_ref[...].astype(jnp.float32)
    pred_p = pred_p_ref[...].astype(jnp.float32)
    labels = labels_ref[...].astype(jnp.float32)
    labels_p = labels_p_ref[...].astype(jnp.float32)

    # Fused reduction: one lane-sum instead of two.
    t = labels * jnp.log(1e-8 + pred) + gamma * (labels_p * jnp.log(1e-8 + pred_p))
    partial = jnp.sum(-t, axis=1, keepdims=True)

    # Output block is resident across the class axis (same block index for all
    # k), so accumulate directly into it; init on the first class tile.
    @pl.when(k == 0)
    def _():
        out_ref[...] = jnp.zeros_like(out_ref)

    out_ref[...] += partial


def two_headed_loss2(pred, pred_p, labels, labels_p, gamma=0.2,
                     block_b=None, block_c=None):
    """Pallas implementation of TwoHeadedLoss2.forward. Returns shape [B]."""
    B, C = pred.shape
    assert pred_p.shape == (B, C)
    assert labels.shape == (B, C)
    assert labels_p.shape == (B, C)

    itemsize = max(jnp.dtype(pred.dtype).itemsize,
                   jnp.dtype(labels.dtype).itemsize)
    auto_b, auto_c = _choose_block_sizes(B, C, itemsize)
    if block_b is None:
        block_b = auto_b
    if block_c is None:
        block_c = auto_c
    # Class-axis blocks must be full-C or a 128-multiple that divides C
    # (padded lanes would corrupt the reduction).
    assert block_c == C or (C % block_c == 0 and block_c % 128 == 0)

    nb = pl.cdiv(B, block_b)   # padded last batch block is safe (rows independent)
    nc = C // block_c

    kernel = functools.partial(_two_headed_loss_kernel, gamma=gamma)

    in_spec = pl.BlockSpec((block_b, block_c), lambda i, k: (i, k))
    out_spec = pl.BlockSpec((block_b, 1), lambda i, k: (i, 0))

    out = pl.pallas_call(
        kernel,
        out_shape=jax.ShapeDtypeStruct((B, 1), jnp.float32),
        grid_spec=pltpu.PrefetchScalarGridSpec(
            num_scalar_prefetch=0,
            grid=(nb, nc),                       # reduction axis last
            in_specs=[in_spec, in_spec, in_spec, in_spec],
            out_specs=out_spec,
        ),
        compiler_params=pltpu.CompilerParams(
            dimension_semantics=("parallel", "arbitrary"),
            vmem_limit_bytes=_VMEM_LIMIT_BYTES,
        ),
    )(pred, pred_p, labels, labels_p)
    return out[:, 0]  # squeeze to [B], matching torch.sum(..., dim=1)


def _reference(pred, pred_p, labels, labels_p, gamma=0.2):
    pe = jnp.sum(-labels.astype(jnp.float32)
                 * jnp.log(1e-8 + pred.astype(jnp.float32)), axis=1)
    pep = jnp.sum(-labels_p.astype(jnp.float32)
                  * jnp.log(1e-8 + pred_p.astype(jnp.float32)), axis=1)
    return pe + gamma * pep


if __name__ == "__main__":
    key = jax.random.PRNGKey(0)

    # --- Test 1: small f32 case, single block (auto tiling picks full array).
    B, C = 8, 128
    k1, k2, k3, k4, k5, k6, k7, k8 = jax.random.split(key, 8)
    pred = jax.nn.softmax(jax.random.normal(k1, (B, C), jnp.float32), axis=-1)
    pred_p = jax.nn.softmax(jax.random.normal(k2, (B, C), jnp.float32), axis=-1)
    labels = jax.nn.one_hot(jax.random.randint(k3, (B,), 0, C), C,
                            dtype=jnp.float32)
    labels_p = jax.nn.one_hot(jax.random.randint(k4, (B,), 0, C), C,
                              dtype=jnp.float32)

    out = jax.block_until_ready(two_headed_loss2(pred, pred_p, labels, labels_p))
    ref = _reference(pred, pred_p, labels, labels_p)
    assert out.shape == (B,)
    assert jnp.allclose(out, ref, atol=1e-5, rtol=1e-5), (out, ref)

    # --- Test 2: bf16 preds, dense labels, forced small blocks to exercise
    # class-axis accumulation and a padded final batch block.
    B2, C2 = 24, 256
    pred2 = jax.nn.softmax(
        jax.random.normal(k5, (B2, C2), jnp.float32), axis=-1).astype(jnp.bfloat16)
    pred_p2 = jax.nn.softmax(
        jax.random.normal(k6, (B2, C2), jnp.float32), axis=-1).astype(jnp.bfloat16)
    labels2 = jax.random.uniform(k7, (B2, C2), jnp.float32)
    labels_p2 = jax.random.uniform(k8, (B2, C2), jnp.float32)

    out2 = jax.block_until_ready(
        two_headed_loss2(pred2, pred_p2, labels2, labels_p2,
                         gamma=0.2, block_b=16, block_c=128))
    ref2 = _reference(pred2, pred_p2, labels2, labels_p2, gamma=0.2)
    assert out2.shape == (B2,)
    assert jnp.allclose(out2, ref2, atol=1e-4, rtol=1e-4), (out2, ref2)

    print("KERNEL_OK")
</pallas_src>

<mosaic_0001>
module attributes {stable_mosaic.version = 11 : i64} {
  func.func @_two_headed_loss_kernel(%arg0: i32, %arg1: i32, %arg2: memref<8x128xf32, #tpu.memory_space<vmem>>, %arg3: memref<8x128xf32, #tpu.memory_space<vmem>>, %arg4: memref<8x128xf32, #tpu.memory_space<vmem>>, %arg5: memref<8x128xf32, #tpu.memory_space<vmem>>, %arg6: memref<8x1xf32, #tpu.memory_space<vmem>>) attributes {dimension_semantics = [#tpu.dimension_semantics<parallel>, #tpu.dimension_semantics<arbitrary>], iteration_bounds = array<i64: 1, 1>, scalar_prefetch = 0 : i64, scratch_operands = 0 : i64, tpu.core_type = #tpu.core_type<tc>, window_params = [{transform_indices = @transform_0, window_bounds = array<i64: 8, 128>}, {transform_indices = @transform_1, window_bounds = array<i64: 8, 128>}, {transform_indices = @transform_2, window_bounds = array<i64: 8, 128>}, {transform_indices = @transform_3, window_bounds = array<i64: 8, 128>}, {transform_indices = @transform_4, window_bounds = array<i64: 8, 1>}]} {
    %c0 = arith.constant 0 : index
    %c0_0 = arith.constant 0 : index
    %0 = vector.load %arg2[%c0, %c0_0] : memref<8x128xf32, #tpu.memory_space<vmem>>, vector<8x128xf32>
    %c0_1 = arith.constant 0 : index
    %c0_2 = arith.constant 0 : index
    %1 = vector.load %arg3[%c0_1, %c0_2] : memref<8x128xf32, #tpu.memory_space<vmem>>, vector<8x128xf32>
    %c0_3 = arith.constant 0 : index
    %c0_4 = arith.constant 0 : index
    %2 = vector.load %arg4[%c0_3, %c0_4] : memref<8x128xf32, #tpu.memory_space<vmem>>, vector<8x128xf32>
    %c0_5 = arith.constant 0 : index
    %c0_6 = arith.constant 0 : index
    %3 = vector.load %arg5[%c0_5, %c0_6] : memref<8x128xf32, #tpu.memory_space<vmem>>, vector<8x128xf32>
    %cst = arith.constant 9.99999993E-9 : f32
    %4 = vector.broadcast %cst : f32 to vector<8x128xf32>
    %5 = arith.addf %4, %0 : vector<8x128xf32>
    %6 = math.log %5 : vector<8x128xf32>
    %7 = arith.mulf %2, %6 : vector<8x128xf32>
    %cst_7 = arith.constant 9.99999993E-9 : f32
    %8 = vector.broadcast %cst_7 : f32 to vector<8x128xf32>
    %9 = arith.addf %8, %1 : vector<8x128xf32>
    %10 = math.log %9 : vector<8x128xf32>
    %11 = arith.mulf %3, %10 : vector<8x128xf32>
    %cst_8 = arith.constant 2.000000e-01 : f32
    %12 = vector.broadcast %cst_8 : f32 to vector<8x128xf32>
    %13 = arith.mulf %12, %11 : vector<8x128xf32>
    %14 = arith.addf %7, %13 : vector<8x128xf32>
    %cst_9 = arith.constant 0.000000e+00 : f32
    %15 = vector.broadcast %cst_9 : f32 to vector<8x128xf32>
    %16 = arith.subf %15, %14 : vector<8x128xf32>
    %cst_10 = arith.constant dense<0.000000e+00> : vector<8xf32>
    %17 = vector.multi_reduction <add>, %16, %cst_10 [1] : vector<8x128xf32> to vector<8xf32>
    %18 = vector.shape_cast %17 : vector<8xf32> to vector<8x1xf32>
    %c0_i32 = arith.constant 0 : i32
    %19 = arith.cmpi eq, %arg1, %c0_i32 : i32
    %20 = arith.extui %19 : i1 to i32
    %c0_i32_11 = arith.constant 0 : i32
    %21 = arith.cmpi ne, %20, %c0_i32_11 : i32
    scf.if %21 {
      %cst_16 = arith.constant 0.000000e+00 : f32
      %25 = vector.broadcast %cst_16 : f32 to vector<8x1xf32>
      %c0_17 = arith.constant 0 : index
      %c0_18 = arith.constant 0 : index
      %26 = vector.load %arg6[%c0_17, %c0_18] : memref<8x1xf32, #tpu.memory_space<vmem>>, vector<8x1xf32>
      tpu.vector_store %arg6[%c0_17, %c0_18], %25 {strides = array<i32>} : memref<8x1xf32, #tpu.memory_space<vmem>>, vector<8x1xf32>,
    } else {
    }
    %c0_12 = arith.constant 0 : index
    %c0_13 = arith.constant 0 : index
    %22 = vector.load %arg6[%c0_12, %c0_13] : memref<8x1xf32, #tpu.memory_space<vmem>>, vector<8x1xf32>
    %23 = arith.addf %22, %18 : vector<8x1xf32>
    %c0_14 = arith.constant 0 : index
    %c0_15 = arith.constant 0 : index
    %24 = vector.load %arg6[%c0_14, %c0_15] : memref<8x1xf32, #tpu.memory_space<vmem>>, vector<8x1xf32>
    tpu.vector_store %arg6[%c0_14, %c0_15], %23 {strides = array<i32>} : memref<8x1xf32, #tpu.memory_space<vmem>>, vector<8x1xf32>,
    return
  }
  func.func @transform_0(%arg0: i32, %arg1: i32) -> (i32, i32) {
    %c0_i32 = arith.constant 0 : i32
    return %arg0, %arg1 : i32, i32
  }
  func.func @transform_1(%arg0: i32, %arg1: i32) -> (i32, i32) {
    %c0_i32 = arith.constant 0 : i32
    return %arg0, %arg1 : i32, i32
  }
  func.func @transform_2(%arg0: i32, %arg1: i32) -> (i32, i32) {
    %c0_i32 = arith.constant 0 : i32
    return %arg0, %arg1 : i32, i32
  }
  func.func @transform_3(%arg0: i32, %arg1: i32) -> (i32, i32) {
    %c0_i32 = arith.constant 0 : i32
    return %arg0, %arg1 : i32, i32
  }
  func.func @transform_4(%arg0: i32, %arg1: i32) -> (i32, i32) {
    %c0_i32 = arith.constant 0 : i32
    %c0_i32_0 = arith.constant 0 : i32
    return %arg0, %c0_i32 : i32, i32
  }
}

</mosaic_0001>

<bundles_post_ra>
// kernel: tpu_custom_call.1
= control target key start
LH: loop header
LB: loop body
LE: loop exit
PB: predicated region body
PF: predicated region fallthrough
CT: control target
= control target key end

     0   :  { %9 = vsyncpa [#allocation3], 0  ;;  %s270_s0 = inlined_call_operand.hbm [shape: f32[8,128], index: 0, kind: input, shape index: {}]   ;;  %s271_s1 = inlined_call_operand.hbm [shape: f32[8,128], index: 1, kind: input, shape index: {}]   ;;  %s272_s2 = inlined_call_operand.hbm [shape: f32[8,128], index: 2, kind: input, shape index: {}]   ;;  %s273_s3 = inlined_call_operand.hbm [shape: f32[8,128], index: 3, kind: input, shape index: {}]   ;;  %s274_s4 = inlined_call_operand.vmem [shape: f32[8,1], index: 4, kind: output, shape index: {}]  }
   0x1   :  { %10 = vsyncpa [#allocation5], 0  ;;  %s28_s17 = sshll.u32 %s271_s1, 4  ;;  %s29_s17 = int_to_ptr.hbm [resolvable:$true] %s28_s17 }
   0x2   :  { %11 = vsyncpa [#allocation8], 0  ;;  %s217_s18 = smov [#allocation4]   ;;  %s17_s22 = sshll.u32 %s270_s0, 4  ;;  %s18_s22 = int_to_ptr.hbm [resolvable:$true] %s17_s22 }
   0x3   :  { %s30_s19 = sshll.u32 %s217_s18, 4  ;;  %s218_s23 = smov [#allocation2]   ;;  %s31_s19 = int_to_ptr.vmem [resolvable:$true] %s30_s19 }
   0x4   :  { %33 = dma.hbm_to_vmem [thread:$0]  %s29_s17, 128, %s31_s19, [#allocation5]  }
   0x5   :  { %s19_s24 = sshll.u32 %s218_s23, 4  ;;  %s39_s27 = sshll.u32 %s272_s2, 4  ;;  %s20_s24 = int_to_ptr.vmem [resolvable:$true] %s19_s24  ;;  %s40_s27 = int_to_ptr.hbm [resolvable:$true] %s39_s27 }
   0x6   :  { %22 = dma.hbm_to_vmem [thread:$0]  %s18_s22, 128, %s20_s24, [#allocation3]  }
   0x7   :  { %s50_s29 = sshll.u32 %s273_s3, 4  ;;  %s219_s30 = smov [#allocation6]   ;;  %s51_s29 = int_to_ptr.hbm [resolvable:$true] %s50_s29 }
   0x8   :  { %s41_s5 = sshll.u32 %s219_s30, 4  ;;  %s220_s0 = smov [#allocation7]   ;;  %s42_s5 = int_to_ptr.vmem [resolvable:$true] %s41_s5 }
   0x9   :  { %44 = dma.hbm_to_vmem [thread:$0]  %s40_s27, 128, %s42_s5, [#allocation5]  }
   0xa   :  { %s52_s6 = sshll.u32 %s220_s0, 4  ;;  %s53_s6 = int_to_ptr.vmem [resolvable:$true] %s52_s6 }
   0xb   :  { %55 = dma.hbm_to_vmem [thread:$0]  %s51_s29, 128, %s53_s6, [#allocation8]  }
   0xc   :  { %211 = dma.done.wait [#allocation3], 128  }
   0xd   :  { %212 = vsyncadd [#allocation3], 4294967168 }
   0xe   :  { %213 = dma.done.wait [#allocation5], 256  }
   0xf   :  { %214 = vsyncadd [#allocation5], 4294967040 }
  0x10   :  { %215 = dma.done.wait [#allocation8], 128  }
  0x11   :  { %216 = vsyncadd [#allocation8], 4294967168  ;;  %vm93_vm0 = vcmask 7168   ;;  %v221_v0 = vmov 0.0   ;;  %v72_v1 = vld [vmem:[#allocation2] sm:$0xff]  ;;  %v73_v2 = vld [vmem:[#allocation4] sm:$0xff] }
  0x12   :  { %94 = vst.msk [vmem:[%s274_s4] sm:$0xff] %vm93_vm0, %v221_v0  ;;  %v76_v3 = vadd.f32 1e-08, %v72_v1  ;;  %v80_v4 = vadd.f32 1e-08, %v73_v2  ;;  %v74_v7 = vld [vmem:[#allocation6] sm:$0xff] }
  0x13   :  { %v75_v8 = vld [vmem:[#allocation7] sm:$0xff] }
  0x14   :  { %111 = vlog2.f32 %v76_v3 }
  0x15   :  { %113 = vlog2.f32 %v80_v4 }
  0x19   :  { %v95_v16 = vld [vmem:[%s274_s4] sm:$0xff] }
  0x1a   :  { %v112_v5 = vpop.eup %111 }
  0x1b   :  { %v114_v6 = vpop.eup %113  ;;  %v78_v9 = vmul.f32 0.6931472, %v112_v5 }
  0x1c   :  { %v82_v10 = vmul.f32 0.6931472, %v114_v6 }
  0x1d   :  { %v79_v11 = vmul.f32 %v78_v9, %v74_v7 }
  0x1e   :  { %v83_v12 = vmul.f32 %v82_v10, %v75_v8 }
  0x20   :  { %v84_v13 = vmul.f32 0.2, %v83_v12 }
  0x22   :  { %v85_v14 = vadd.f32 %v84_v13, %v79_v11 }
  0x24   :  { %v86_v15 = vsub.f32 0.0, %v85_v14 }
  0x26   :  { %87 = vadd.xlane.f32.xlu0 %v86_v15 }
  0x99   :  { %v88_v17 = vpop.xlane.xlu0 %87 }
  0x9a   :  { %v96_v18 = vadd.f32 %v95_v16, %v88_v17 }
  0x9c   :  { %98 = vst.msk [vmem:[%s274_s4] sm:$0xff] %vm93_vm0, %v96_v18 }
  0x9d   :  { %103 = vsyncpa [#allocation3], 1 }
  0x9e   :  { %104 = vsyncpa [#allocation5], 1 }
  0x9f   :  { %105 = vsyncpa [#allocation8], 1 }

</bundles_post_ra>
